<compile_context>
chip_gen: v7x
topology: tpu7x:2x2x1
jax: 0.10.0
libtpu: 0.0.40
codegen_flags: <defaults>
</compile_context>

<pallas_src>
import functools

import jax
import jax.numpy as jnp
from jax import lax
from jax.experimental import pallas as pl
from jax.experimental.pallas import tpu as pltpu

# The PyTorch module constructs LayerNorm(dim, eps=1e-06) explicitly.
EPS = 1e-6


def _hw_budgets():
    """Return (streamed-tile byte budget, scoped-VMEM limit) per generation."""
    try:
        vmem_cap = int(pltpu.get_tpu_info().vmem_capacity_bytes)
        if vmem_cap >= 100 * 1024 * 1024:            # v5e / v6e: 128 MiB VMEM
            return 8 * 1024 * 1024, 96 * 1024 * 1024
        return 4 * 1024 * 1024, 40 * 1024 * 1024     # v7x: 64 MiB VMEM
    except Exception:
        return 6 * 1024 * 1024, 48 * 1024 * 1024     # safe on every generation


def _pick_spatial_tile(hw, c, itemsize, budget):
    """Lane tile width: multiple of 128 (or hw itself when hw <= 128), sized to
    the per-block byte budget.  The grid uses pl.cdiv(hw, thw); a ragged last
    block is masked in the pool kernel and write-clipped in the add kernel."""
    if hw <= 128:
        return hw
    max_lanes = max(128, (budget // max(1, c * itemsize)) // 128 * 128)
    if hw % 128 == 0:
        if hw <= max_lanes:
            return hw
        t = max_lanes
        while t >= 128:                 # prefer an exact divisor: no ragged tail
            if hw % t == 0:
                return t
            t -= 128
        return max_lanes
    return min(max_lanes, (hw // 128) * 128)


def _layernorm_lastdim(y, gamma, beta):
    """LayerNorm over the last (channel) axis, eps=1e-6; rsqrt runs on the EUP."""
    u = jnp.mean(y, axis=-1, keepdims=True)
    s = jnp.mean((y - u) ** 2, axis=-1, keepdims=True)
    return (y - u) * lax.rsqrt(s + EPS) * gamma + beta


# --------------------------- pass 1: spatial sum -----------------------------
def _pool_kernel(x_ref, sum_ref, acc_ref, *, hw, thw, chunk, ragged):
    # x_ref: (1, C, thw) input tile; acc_ref: (1, C, chunk) f32 lane-dense
    # accumulator (scratch, persists across the "arbitrary" spatial axis);
    # sum_ref: (1, C, 1) f32 per-channel spatial SUM, written on the last step.
    s = pl.program_id(1)

    @pl.when(s == 0)
    def _():
        acc_ref[...] = jnp.zeros_like(acc_ref)

    x = x_ref[...].astype(jnp.float32)
    if ragged:
        # Last block may overrun HW: mask garbage lanes before accumulating.
        lane = lax.broadcasted_iota(jnp.int32, x.shape, 2)
        x = jnp.where(s * thw + lane < hw, x, 0.0)

    # Lane-dense partial sum: 128-lane slices are layout preserving, so this is
    # pure VPU adds across vregs — no per-step cross-lane (XLU) reduction.
    part = x[:, :, 0:chunk]
    for j in range(1, thw // chunk):
        part = part + x[:, :, j * chunk:(j + 1) * chunk]
    acc_ref[...] += part

    @pl.when(s == pl.num_programs(1) - 1)
    def _():
        # Single cross-lane reduce per (b) — outside the streaming loop.
        sum_ref[...] = jnp.sum(acc_ref[...], axis=-1, keepdims=True)


# ------------------- pass 2: tiny per-channel MLP (M = B) --------------------
def _mlp_kernel(pooled_ref, vec_ref, w1_ref, w2_ref, y_ref):
    # pooled_ref: (B, C) f32 per-channel spatial SUMS (1/HW is folded into dw_w).
    # vec_ref: (8, C) packed rows = [dw_w/HW, dw_b, norm_w, norm_b, b1, grn_w, grn_b, b2]
    # w1_ref/w2_ref: (C, C) weights, typically bfloat16 (MXU ingest), f32 accum.
    p = pooled_ref[...]
    v = vec_ref[...]
    dw_w, dw_b = v[0:1, :], v[1:2, :]
    nw, nb = v[2:3, :], v[3:4, :]
    b1 = v[4:5, :]
    gw, gb = v[5:6, :], v[6:7, :]
    b2 = v[7:8, :]

    y = p * dw_w + dw_b                                   # 1x1 depthwise conv (mean folded)
    y = _layernorm_lastdim(y, nw, nb)                     # norm
    y = jnp.dot(y.astype(w1_ref.dtype), w1_ref[...],
                preferred_element_type=jnp.float32) + b1
    y = jnp.maximum(y, 0.0)                               # ReLU
    y = _layernorm_lastdim(y, gw, gb)                     # grn
    y = jnp.dot(y.astype(w2_ref.dtype), w2_ref[...],
                preferred_element_type=jnp.float32) + b2
    y_ref[...] = y


# ------------------- pass 3: broadcast residual add --------------------------
def _add_kernel(x_ref, y_ref, o_ref):
    # x_ref: (1, C, thw); y_ref: (1, C, 1).  Residual add in the input dtype.
    # A ragged last block only writes the in-bounds lanes back to HBM.
    o_ref[...] = x_ref[...] + y_ref[...].astype(o_ref.dtype)


# ------------------------------- wrapper --------------------------------------
def se_forward(x_nchw, params, *, mlp_weight_dtype=jnp.bfloat16):
    """x_nchw: (B, C, H, W). params: dict of SE parameters (see make_params).

    For a true in-place residual update (pass 3 aliases its input), donate
    x_nchw to the surrounding jit; otherwise XLA inserts a defensive copy.
    """
    B, C, H, W = x_nchw.shape
    out_dim = params["w2_t"].shape[1]
    if out_dim != C:
        raise ValueError(
            f"SE residual `input + x` requires outdim == dim; got {out_dim} != {C}")

    tile_budget, vmem_limit = _hw_budgets()
    HW = H * W
    x3 = x_nchw.reshape(B, C, HW)
    thw = _pick_spatial_tile(HW, C, x_nchw.dtype.itemsize, tile_budget)
    n_s = pl.cdiv(HW, thw)
    ragged = (HW % thw) != 0
    chunk = 128 if thw % 128 == 0 else thw

    # ---- pass 1: per-channel spatial sum (AdaptiveAvgPool2d(1) * HW) --------
    pooled3 = pl.pallas_call(
        functools.partial(_pool_kernel, hw=HW, thw=thw, chunk=chunk, ragged=ragged),
        out_shape=jax.ShapeDtypeStruct((B, C, 1), jnp.float32),
        grid=(B, n_s),
        in_specs=[pl.BlockSpec((1, C, thw), lambda b, s: (b, 0, s))],
        out_specs=pl.BlockSpec((1, C, 1), lambda b, s: (b, 0, 0)),
        scratch_shapes=[pltpu.VMEM((1, C, chunk), jnp.float32)],
        compiler_params=pltpu.CompilerParams(
            dimension_semantics=("parallel", "arbitrary"),
            vmem_limit_bytes=vmem_limit),
    )(x3)

    # ---- pass 2: tiny MLP, hoisted out of the streaming loop ----------------
    inv_hw = 1.0 / float(HW)
    vec_pack = jnp.concatenate(
        [params["dw_w"] * inv_hw, params["dw_b"],       # 1/HW folded into dw_w
         params["norm_w"], params["norm_b"],
         params["b1"],
         params["grn_w"], params["grn_b"],
         params["b2"]], axis=0).astype(jnp.float32)      # (8, C)
    w1 = params["w1_t"].astype(mlp_weight_dtype)         # bf16 by default:
    w2 = params["w2_t"].astype(mlp_weight_dtype)         # halves weight DMA/VMEM

    y = pl.pallas_call(
        _mlp_kernel,
        out_shape=jax.ShapeDtypeStruct((B, C), jnp.float32),
        grid=(1,),
        in_specs=[
            pl.BlockSpec((B, C), lambda i: (0, 0)),      # pooled sums
            pl.BlockSpec((8, C), lambda i: (0, 0)),      # packed per-channel vectors
            pl.BlockSpec((C, C), lambda i: (0, 0)),      # W1^T (in, out)
            pl.BlockSpec((C, C), lambda i: (0, 0)),      # W2^T (in, out)
        ],
        out_specs=pl.BlockSpec((B, C), lambda i: (0, 0)),
        compiler_params=pltpu.CompilerParams(
            dimension_semantics=("arbitrary",),
            vmem_limit_bytes=vmem_limit),
    )(pooled3.reshape(B, C), vec_pack, w1, w2)

    # ---- pass 3: broadcast excitation over space, residual add --------------
    out3 = pl.pallas_call(
        _add_kernel,
        out_shape=jax.ShapeDtypeStruct((B, C, HW), x_nchw.dtype),
        grid=(B, n_s),
        in_specs=[
            pl.BlockSpec((1, C, thw), lambda b, s: (b, 0, s)),   # x tile
            pl.BlockSpec((1, C, 1), lambda b, s: (b, 0, 0)),     # excitation
        ],
        out_specs=pl.BlockSpec((1, C, thw), lambda b, s: (b, 0, s)),
        input_output_aliases={0: 0},
        compiler_params=pltpu.CompilerParams(
            dimension_semantics=("parallel", "parallel"),
            vmem_limit_bytes=vmem_limit),
    )(x3, y.reshape(B, C, 1))

    return out3.reshape(B, C, H, W)


# ------------------------------ reference ------------------------------------
def se_reference(x_nchw, params, *, mlp_weight_dtype=jnp.float32):
    """Pure-JAX reference mirroring the PyTorch forward.

    mlp_weight_dtype=jnp.bfloat16 mirrors the kernel's bf16 MXU ingest
    (weights AND matmul activations cast to bf16, f32 accumulation)."""
    def mm(a, w, b):
        aw = a.astype(mlp_weight_dtype).astype(jnp.float32)
        ww = w.astype(mlp_weight_dtype).astype(jnp.float32)
        return aw @ ww + b

    pooled = jnp.mean(x_nchw.astype(jnp.float32), axis=(2, 3))   # (B, C)
    y = pooled * params["dw_w"] + params["dw_b"]
    y = _layernorm_lastdim(y, params["norm_w"], params["norm_b"])
    y = jnp.maximum(mm(y, params["w1_t"], params["b1"]), 0.0)
    y = _layernorm_lastdim(y, params["grn_w"], params["grn_b"])
    y = mm(y, params["w2_t"], params["b2"])                      # (B, outdim)
    return x_nchw + y[:, :, None, None].astype(x_nchw.dtype)


def make_params(key, dim, outdim):
    ks = jax.random.split(key, 6)
    return {
        # Conv2d(dim, dim, 1, groups=dim): weight (dim,1,1,1) -> (1,dim), bias (dim,)
        "dw_w": jax.random.normal(ks[0], (1, dim), jnp.float32) * 0.5,
        "dw_b": jax.random.normal(ks[1], (1, dim), jnp.float32) * 0.1,
        # LayerNorm(dim): ones / zeros at init
        "norm_w": jnp.ones((1, dim), jnp.float32),
        "norm_b": jnp.zeros((1, dim), jnp.float32),
        # Linear(dim, dim): PyTorch weight is (out,in); pass transposed (in,out)
        "w1_t": jax.random.normal(ks[2], (dim, dim), jnp.float32) * 0.2,
        "b1": jax.random.normal(ks[3], (1, dim), jnp.float32) * 0.1,
        "grn_w": jnp.ones((1, dim), jnp.float32),
        "grn_b": jnp.zeros((1, dim), jnp.float32),
        # Linear(dim, outdim)
        "w2_t": jax.random.normal(ks[4], (dim, outdim), jnp.float32) * 0.2,
        "b2": jax.random.normal(ks[5], (1, outdim), jnp.float32) * 0.1,
    }


def _fwd_exact(x, params):          # f32 MLP weights — bitwise-faithful path
    return se_forward(x, params, mlp_weight_dtype=jnp.float32)


def _fwd_fast(x, params):           # bf16 MLP weights — deployment path
    return se_forward(x, params, mlp_weight_dtype=jnp.bfloat16)


if __name__ == "__main__":
    key = jax.random.PRNGKey(0)
    kx, kp, kx2, kp2 = jax.random.split(key, 4)

    # ---- main test: B=2, C=4, 16x16 (128-aligned spatial) --------------------
    B, dim, H, W = 2, 4, 16, 16
    x = jax.random.normal(kx, (B, dim, H, W), jnp.float32)
    params = make_params(kp, dim, dim)

    # exact (f32-weight) path vs. the pure-f32 reference
    out_exact = jax.block_until_ready(jax.jit(_fwd_exact)(x, params))
    ref_exact = se_reference(x, params, mlp_weight_dtype=jnp.float32)
    assert out_exact.shape == (B, dim, H, W)
    assert jnp.allclose(out_exact, ref_exact, atol=1e-4, rtol=1e-4), \
        "f32-weight kernel mismatch vs reference"

    # bf16-weight path with donated input (true in-place pass-3 aliasing)
    fwd_fast = jax.jit(_fwd_fast, donate_argnums=(0,))
    ref_fast = se_reference(x, params, mlp_weight_dtype=jnp.bfloat16)
    out_fast = jax.block_until_ready(fwd_fast(jnp.copy(x), params))
    assert jnp.allclose(out_fast, ref_fast, atol=1e-3, rtol=1e-3), \
        "bf16-weight kernel mismatch vs bf16 reference"

    # ---- ragged spatial test: 13x13 (HW=169, not 128-aligned) ----------------
    B2, dim2, H2, W2 = 1, 8, 13, 13
    x2 = jax.random.normal(kx2, (B2, dim2, H2, W2), jnp.float32)
    params2 = make_params(kp2, dim2, dim2)
    out2 = jax.block_until_ready(jax.jit(_fwd_exact)(x2, params2))
    ref2 = se_reference(x2, params2, mlp_weight_dtype=jnp.float32)
    assert out2.shape == (B2, dim2, H2, W2)
    assert jnp.allclose(out2, ref2, atol=1e-4, rtol=1e-4), \
        "ragged-HW kernel mismatch vs reference"

    print("KERNEL_OK")
</pallas_src>

<mosaic_0001>
module attributes {stable_mosaic.version = 11 : i64} {
  func.func @_pool_kernel(%arg0: i32, %arg1: i32, %arg2: memref<1x4x256xf32, #tpu.memory_space<vmem>>, %arg3: memref<1x4x1xf32, #tpu.memory_space<vmem>>, %arg4: memref<1x4x128xf32, #tpu.memory_space<vmem>>) attributes {dimension_semantics = [#tpu.dimension_semantics<parallel>, #tpu.dimension_semantics<arbitrary>], iteration_bounds = array<i64: 2, 1>, scalar_prefetch = 0 : i64, scratch_operands = 1 : i64, tpu.core_type = #tpu.core_type<tc>, window_params = [{transform_indices = @transform_0, window_bounds = array<i64: 1, 4, 256>}, {transform_indices = @transform_1, window_bounds = array<i64: 1, 4, 1>}]} {
    %c0_i32 = arith.constant 0 : i32
    %0 = arith.cmpi eq, %arg1, %c0_i32 : i32
    %1 = arith.extui %0 : i1 to i32
    %c0_i32_0 = arith.constant 0 : i32
    %2 = arith.cmpi ne, %1, %c0_i32_0 : i32
    scf.if %2 {
      %cst = arith.constant 0.000000e+00 : f32
      %13 = vector.broadcast %cst : f32 to vector<1x4x128xf32>
      %c0_11 = arith.constant 0 : index
      %c0_12 = arith.constant 0 : index
      %c0_13 = arith.constant 0 : index
      %14 = vector.load %arg4[%c0_11, %c0_12, %c0_13] : memref<1x4x128xf32, #tpu.memory_space<vmem>>, vector<1x4x128xf32>
      tpu.vector_store %arg4[%c0_11, %c0_12, %c0_13], %13 {strides = array<i32>} : memref<1x4x128xf32, #tpu.memory_space<vmem>>, vector<1x4x128xf32>,
    } else {
    }
    %c0 = arith.constant 0 : index
    %c0_1 = arith.constant 0 : index
    %c0_2 = arith.constant 0 : index
    %3 = vector.load %arg2[%c0, %c0_1, %c0_2] : memref<1x4x256xf32, #tpu.memory_space<vmem>>, vector<1x4x256xf32>
    %4 = vector.extract_strided_slice %3 {offsets = [0, 0, 0], sizes = [1, 4, 128], strides = [1, 1, 1]} : vector<1x4x256xf32> to vector<1x4x128xf32>
    %5 = vector.extract_strided_slice %3 {offsets = [0, 0, 128], sizes = [1, 4, 128], strides = [1, 1, 1]} : vector<1x4x256xf32> to vector<1x4x128xf32>
    %6 = arith.addf %4, %5 : vector<1x4x128xf32>
    %c0_3 = arith.constant 0 : index
    %c0_4 = arith.constant 0 : index
    %c0_5 = arith.constant 0 : index
    %7 = vector.load %arg4[%c0_3, %c0_4, %c0_5] : memref<1x4x128xf32, #tpu.memory_space<vmem>>, vector<1x4x128xf32>
    %8 = arith.addf %7, %6 : vector<1x4x128xf32>
    %c0_6 = arith.constant 0 : index
    %c0_7 = arith.constant 0 : index
    %c0_8 = arith.constant 0 : index
    %9 = vector.load %arg4[%c0_6, %c0_7, %c0_8] : memref<1x4x128xf32, #tpu.memory_space<vmem>>, vector<1x4x128xf32>
    tpu.vector_store %arg4[%c0_6, %c0_7, %c0_8], %8 {strides = array<i32>} : memref<1x4x128xf32, #tpu.memory_space<vmem>>, vector<1x4x128xf32>,
    %c0_i32_9 = arith.constant 0 : i32
    %10 = arith.cmpi eq, %arg1, %c0_i32_9 : i32
    %11 = arith.extui %10 : i1 to i32
    %c0_i32_10 = arith.constant 0 : i32
    %12 = arith.cmpi ne, %11, %c0_i32_10 : i32
    scf.if %12 {
      %c0_11 = arith.constant 0 : index
      %c0_12 = arith.constant 0 : index
      %c0_13 = arith.constant 0 : index
      %13 = vector.load %arg4[%c0_11, %c0_12, %c0_13] : memref<1x4x128xf32, #tpu.memory_space<vmem>>, vector<1x4x128xf32>
      %cst = arith.constant dense<0.000000e+00> : vector<1x4xf32>
      %14 = vector.multi_reduction <add>, %13, %cst [2] : vector<1x4x128xf32> to vector<1x4xf32>
      %15 = vector.shape_cast %14 : vector<1x4xf32> to vector<1x4x1xf32>
      %c0_14 = arith.constant 0 : index
      %c0_15 = arith.constant 0 : index
      %c0_16 = arith.constant 0 : index
      %16 = vector.load %arg3[%c0_14, %c0_15, %c0_16] : memref<1x4x1xf32, #tpu.memory_space<vmem>>, vector<1x4x1xf32>
      tpu.vector_store %arg3[%c0_14, %c0_15, %c0_16], %15 {strides = array<i32>} : memref<1x4x1xf32, #tpu.memory_space<vmem>>, vector<1x4x1xf32>,
    } else {
    }
    return
  }
  func.func @transform_0(%arg0: i32, %arg1: i32) -> (i32, i32, i32) {
    %c0_i32 = arith.constant 0 : i32
    %c0_i32_0 = arith.constant 0 : i32
    return %arg0, %c0_i32, %arg1 : i32, i32, i32
  }
  func.func @transform_1(%arg0: i32, %arg1: i32) -> (i32, i32, i32) {
    %c0_i32 = arith.constant 0 : i32
    %c0_i32_0 = arith.constant 0 : i32
    %c0_i32_1 = arith.constant 0 : i32
    return %arg0, %c0_i32, %c0_i32_0 : i32, i32, i32
  }
}

module attributes {stable_mosaic.version = 11 : i64} {
  func.func @_mlp_kernel(%arg0: i32, %arg1: memref<2x4xf32, #tpu.memory_space<vmem>>, %arg2: memref<8x4xf32, #tpu.memory_space<vmem>>, %arg3: memref<4x4xf32, #tpu.memory_space<vmem>>, %arg4: memref<4x4xf32, #tpu.memory_space<vmem>>, %arg5: memref<2x4xf32, #tpu.memory_space<vmem>>) attributes {dimension_semantics = [#tpu.dimension_semantics<arbitrary>], iteration_bounds = array<i64: 1>, scalar_prefetch = 0 : i64, scratch_operands = 0 : i64, tpu.core_type = #tpu.core_type<tc>, window_params = [{pipeline_mode = #tpu.pipeline_mode<synchronous>, transform_indices = @transform_0, window_bounds = array<i64: 2, 4>}, {pipeline_mode = #tpu.pipeline_mode<synchronous>, transform_indices = @transform_1, window_bounds = array<i64: 8, 4>}, {pipeline_mode = #tpu.pipeline_mode<synchronous>, transform_indices = @transform_2, window_bounds = array<i64: 4, 4>}, {pipeline_mode = #tpu.pipeline_mode<synchronous>, transform_indices = @transform_3, window_bounds = array<i64: 4, 4>}, {pipeline_mode = #tpu.pipeline_mode<synchronous>, transform_indices = @transform_4, window_bounds = array<i64: 2, 4>}]} {
    %c0 = arith.constant 0 : index
    %c0_0 = arith.constant 0 : index
    %0 = vector.load %arg1[%c0, %c0_0] : memref<2x4xf32, #tpu.memory_space<vmem>>, vector<2x4xf32>
    %c0_1 = arith.constant 0 : index
    %c0_2 = arith.constant 0 : index
    %1 = vector.load %arg2[%c0_1, %c0_2] : memref<8x4xf32, #tpu.memory_space<vmem>>, vector<8x4xf32>
    %2 = vector.extract_strided_slice %1 {offsets = [0, 0], sizes = [1, 4], strides = [1, 1]} : vector<8x4xf32> to vector<1x4xf32>
    %3 = vector.extract_strided_slice %1 {offsets = [1, 0], sizes = [1, 4], strides = [1, 1]} : vector<8x4xf32> to vector<1x4xf32>
    %4 = vector.extract_strided_slice %1 {offsets = [2, 0], sizes = [1, 4], strides = [1, 1]} : vector<8x4xf32> to vector<1x4xf32>
    %5 = vector.extract_strided_slice %1 {offsets = [3, 0], sizes = [1, 4], strides = [1, 1]} : vector<8x4xf32> to vector<1x4xf32>
    %6 = vector.extract_strided_slice %1 {offsets = [4, 0], sizes = [1, 4], strides = [1, 1]} : vector<8x4xf32> to vector<1x4xf32>
    %7 = vector.extract_strided_slice %1 {offsets = [5, 0], sizes = [1, 4], strides = [1, 1]} : vector<8x4xf32> to vector<1x4xf32>
    %8 = vector.extract_strided_slice %1 {offsets = [6, 0], sizes = [1, 4], strides = [1, 1]} : vector<8x4xf32> to vector<1x4xf32>
    %9 = vector.extract_strided_slice %1 {offsets = [7, 0], sizes = [1, 4], strides = [1, 1]} : vector<8x4xf32> to vector<1x4xf32>
    %10 = vector.broadcast %2 : vector<1x4xf32> to vector<2x4xf32>
    %11 = arith.mulf %0, %10 : vector<2x4xf32>
    %12 = vector.broadcast %3 : vector<1x4xf32> to vector<2x4xf32>
    %13 = arith.addf %11, %12 : vector<2x4xf32>
    %cst = arith.constant dense<0.000000e+00> : vector<2xf32>
    %14 = vector.multi_reduction <add>, %13, %cst [1] : vector<2x4xf32> to vector<2xf32>
    %15 = vector.shape_cast %14 : vector<2xf32> to vector<2x1xf32>
    %cst_3 = arith.constant 4.000000e+00 : f32
    %16 = vector.broadcast %cst_3 : f32 to vector<2x1xf32>
    %17 = arith.divf %15, %16 : vector<2x1xf32>
    %18 = vector.broadcast %17 : vector<2x1xf32> to vector<2x4xf32>
    %19 = arith.subf %13, %18 : vector<2x4xf32>
    %20 = arith.mulf %19, %19 : vector<2x4xf32>
    %cst_4 = arith.constant dense<0.000000e+00> : vector<2xf32>
    %21 = vector.multi_reduction <add>, %20, %cst_4 [1] : vector<2x4xf32> to vector<2xf32>
    %22 = vector.shape_cast %21 : vector<2xf32> to vector<2x1xf32>
    %cst_5 = arith.constant 4.000000e+00 : f32
    %23 = vector.broadcast %cst_5 : f32 to vector<2x1xf32>
    %24 = arith.divf %22, %23 : vector<2x1xf32>
    %25 = vector.broadcast %17 : vector<2x1xf32> to vector<2x4xf32>
    %26 = arith.subf %13, %25 : vector<2x4xf32>
    %cst_6 = arith.constant 9.99999997E-7 : f32
    %27 = vector.broadcast %cst_6 : f32 to vector<2x1xf32>
    %28 = arith.addf %24, %27 : vector<2x1xf32>
    %29 = math.rsqrt %28 : vector<2x1xf32>
    %30 = vector.broadcast %29 : vector<2x1xf32> to vector<2x4xf32>
    %31 = arith.mulf %26, %30 : vector<2x4xf32>
    %32 = vector.broadcast %4 : vector<1x4xf32> to vector<2x4xf32>
    %33 = arith.mulf %31, %32 : vector<2x4xf32>
    %34 = vector.broadcast %5 : vector<1x4xf32> to vector<2x4xf32>
    %35 = arith.addf %33, %34 : vector<2x4xf32>
    %c0_7 = arith.constant 0 : index
    %c0_8 = arith.constant 0 : index
    %36 = vector.load %arg3[%c0_7, %c0_8] : memref<4x4xf32, #tpu.memory_space<vmem>>, vector<4x4xf32>
    %cst_9 = arith.constant dense<0.000000e+00> : vector<2x4xf32>
    %37 = tpu.matmul %35, %36, %cst_9 {dimension_numbers = #tpu.dot_dimension_numbers<[1], [0], [0], [1], [0, 0, 1, 1], [], []>} : vector<2x4xf32>, vector<4x4xf32>, vector<2x4xf32> -> vector<2x4xf32>
    %38 = vector.broadcast %6 : vector<1x4xf32> to vector<2x4xf32>
    %39 = arith.addf %37, %38 : vector<2x4xf32>
    %cst_10 = arith.constant 0.000000e+00 : f32
    %40 = vector.broadcast %cst_10 : f32 to vector<2x4xf32>
    %41 = arith.maximumf %39, %40 : vector<2x4xf32>
    %cst_11 = arith.constant dense<0.000000e+00> : vector<2xf32>
    %42 = vector.multi_reduction <add>, %41, %cst_11 [1] : vector<2x4xf32> to vector<2xf32>
    %43 = vector.shape_cast %42 : vector<2xf32> to vector<2x1xf32>
    %cst_12 = arith.constant 4.000000e+00 : f32
    %44 = vector.broadcast %cst_12 : f32 to vector<2x1xf32>
    %45 = arith.divf %43, %44 : vector<2x1xf32>
    %46 = vector.broadcast %45 : vector<2x1xf32> to vector<2x4xf32>
    %47 = arith.subf %41, %46 : vector<2x4xf32>
    %48 = arith.mulf %47, %47 : vector<2x4xf32>
    %cst_13 = arith.constant dense<0.000000e+00> : vector<2xf32>
    %49 = vector.multi_reduction <add>, %48, %cst_13 [1] : vector<2x4xf32> to vector<2xf32>
    %50 = vector.shape_cast %49 : vector<2xf32> to vector<2x1xf32>
    %cst_14 = arith.constant 4.000000e+00 : f32
    %51 = vector.broadcast %cst_14 : f32 to vector<2x1xf32>
    %52 = arith.divf %50, %51 : vector<2x1xf32>
    %53 = vector.broadcast %45 : vector<2x1xf32> to vector<2x4xf32>
    %54 = arith.subf %41, %53 : vector<2x4xf32>
    %cst_15 = arith.constant 9.99999997E-7 : f32
    %55 = vector.broadcast %cst_15 : f32 to vector<2x1xf32>
    %56 = arith.addf %52, %55 : vector<2x1xf32>
    %57 = math.rsqrt %56 : vector<2x1xf32>
    %58 = vector.broadcast %57 : vector<2x1xf32> to vector<2x4xf32>
    %59 = arith.mulf %54, %58 : vector<2x4xf32>
    %60 = vector.broadcast %7 : vector<1x4xf32> to vector<2x4xf32>
    %61 = arith.mulf %59, %60 : vector<2x4xf32>
    %62 = vector.broadcast %8 : vector<1x4xf32> to vector<2x4xf32>
    %63 = arith.addf %61, %62 : vector<2x4xf32>
    %c0_16 = arith.constant 0 : index
    %c0_17 = arith.constant 0 : index
    %64 = vector.load %arg4[%c0_16, %c0_17] : memref<4x4xf32, #tpu.memory_space<vmem>>, vector<4x4xf32>
    %cst_18 = arith.constant dense<0.000000e+00> : vector<2x4xf32>
    %65 = tpu.matmul %63, %64, %cst_18 {dimension_numbers = #tpu.dot_dimension_numbers<[1], [0], [0], [1], [0, 0, 1, 1], [], []>} : vector<2x4xf32>, vector<4x4xf32>, vector<2x4xf32> -> vector<2x4xf32>
    %66 = vector.broadcast %9 : vector<1x4xf32> to vector<2x4xf32>
    %67 = arith.addf %65, %66 : vector<2x4xf32>
    %c0_19 = arith.constant 0 : index
    %c0_20 = arith.constant 0 : index
    %68 = vector.load %arg5[%c0_19, %c0_20] : memref<2x4xf32, #tpu.memory_space<vmem>>, vector<2x4xf32>
    tpu.vector_store %arg5[%c0_19, %c0_20], %67 {strides = array<i32>} : memref<2x4xf32, #tpu.memory_space<vmem>>, vector<2x4xf32>,
    return
  }
  func.func @transform_0(%arg0: i32) -> (i32, i32) {
    %c0_i32 = arith.constant 0 : i32
    %c0_i32_0 = arith.constant 0 : i32
    %c0_i32_1 = arith.constant 0 : i32
    return %c0_i32, %c0_i32_0 : i32, i32
  }
  func.func @transform_1(%arg0: i32) -> (i32, i32) {
    %c0_i32 = arith.constant 0 : i32
    %c0_i32_0 = arith.constant 0 : i32
    %c0_i32_1 = arith.constant 0 : i32
    return %c0_i32, %c0_i32_0 : i32, i32
  }
  func.func @transform_2(%arg0: i32) -> (i32, i32) {
    %c0_i32 = arith.constant 0 : i32
    %c0_i32_0 = arith.constant 0 : i32
    %c0_i32_1 = arith.constant 0 : i32
    return %c0_i32, %c0_i32_0 : i32, i32
  }
  func.func @transform_3(%arg0: i32) -> (i32, i32) {
    %c0_i32 = arith.constant 0 : i32
    %c0_i32_0 = arith.constant 0 : i32
    %c0_i32_1 = arith.constant 0 : i32
    return %c0_i32, %c0_i32_0 : i32, i32
  }
  func.func @transform_4(%arg0: i32) -> (i32, i32) {
    %c0_i32 = arith.constant 0 : i32
    %c0_i32_0 = arith.constant 0 : i32
    %c0_i32_1 = arith.constant 0 : i32
    return %c0_i32, %c0_i32_0 : i32, i32
  }
}

module attributes {stable_mosaic.version = 11 : i64} {
  func.func @_add_kernel(%arg0: i32, %arg1: i32, %arg2: memref<1x4x256xf32, #tpu.memory_space<vmem>>, %arg3: memref<1x4x1xf32, #tpu.memory_space<vmem>>, %arg4: memref<1x4x256xf32, #tpu.memory_space<vmem>>) attributes {dimension_semantics = [#tpu.dimension_semantics<parallel>, #tpu.dimension_semantics<parallel>], iteration_bounds = array<i64: 2, 1>, scalar_prefetch = 0 : i64, scratch_operands = 0 : i64, tpu.core_type = #tpu.core_type<tc>, window_params = [{transform_indices = @transform_0, window_bounds = array<i64: 1, 4, 256>}, {transform_indices = @transform_1, window_bounds = array<i64: 1, 4, 1>}, {transform_indices = @transform_2, window_bounds = array<i64: 1, 4, 256>}]} {
    %c0 = arith.constant 0 : index
    %c0_0 = arith.constant 0 : index
    %c0_1 = arith.constant 0 : index
    %0 = vector.load %arg2[%c0, %c0_0, %c0_1] : memref<1x4x256xf32, #tpu.memory_space<vmem>>, vector<1x4x256xf32>
    %c0_2 = arith.constant 0 : index
    %c0_3 = arith.constant 0 : index
    %c0_4 = arith.constant 0 : index
    %1 = vector.load %arg3[%c0_2, %c0_3, %c0_4] : memref<1x4x1xf32, #tpu.memory_space<vmem>>, vector<1x4x1xf32>
    %2 = vector.broadcast %1 : vector<1x4x1xf32> to vector<1x4x256xf32>
    %3 = arith.addf %0, %2 : vector<1x4x256xf32>
    %c0_5 = arith.constant 0 : index
    %c0_6 = arith.constant 0 : index
    %c0_7 = arith.constant 0 : index
    %4 = vector.load %arg4[%c0_5, %c0_6, %c0_7] : memref<1x4x256xf32, #tpu.memory_space<vmem>>, vector<1x4x256xf32>
    tpu.vector_store %arg4[%c0_5, %c0_6, %c0_7], %3 {strides = array<i32>} : memref<1x4x256xf32, #tpu.memory_space<vmem>>, vector<1x4x256xf32>,
    return
  }
  func.func @transform_0(%arg0: i32, %arg1: i32) -> (i32, i32, i32) {
    %c0_i32 = arith.constant 0 : i32
    %c0_i32_0 = arith.constant 0 : i32
    return %arg0, %c0_i32, %arg1 : i32, i32, i32
  }
  func.func @transform_1(%arg0: i32, %arg1: i32) -> (i32, i32, i32) {
    %c0_i32 = arith.constant 0 : i32
    %c0_i32_0 = arith.constant 0 : i32
    %c0_i32_1 = arith.constant 0 : i32
    return %arg0, %c0_i32, %c0_i32_0 : i32, i32, i32
  }
  func.func @transform_2(%arg0: i32, %arg1: i32) -> (i32, i32, i32) {
    %c0_i32 = arith.constant 0 : i32
    %c0_i32_0 = arith.constant 0 : i32
    return %arg0, %c0_i32, %arg1 : i32, i32, i32
  }
}

</mosaic_0001>

<bundles_post_ra>
// kernel: _fwd_exact.5
= control target key start
LH: loop header
LB: loop body
LE: loop exit
PB: predicated region body
PF: predicated region fallthrough
CT: control target
= control target key end

     0   :  { %s397_s9 = smov 0   ;;  %s399_s10 = smov 0   ;;  %s430_s0 = inlined_call_operand.vmem [shape: f32[2,4,256], index: 0, kind: input, shape index: {}, may-alias: {0,2}]   ;;  %s431_s1 = inlined_call_operand.vmem [shape: f32[2,4,1], index: 1, kind: input, shape index: {}]   ;;  %s432_s2 = inlined_call_operand.vmem [shape: f32[2,4,256], index: 2, kind: output, shape index: {}, may-alias: {0,2}]  }
   0x1   :  { %s401_s11 = smov 0  }
   0x2 LB: > { %s24_s12 = sadd.s32 1, %s374_s10  ;;  %p319_p0 = scmp.ge.s32.totalorder %s378_s11, 1  ;;  %s378_s11 = sphi %s401_s11, %s12_s11   ;;  %s374_s10 = sphi %s399_s10, %s434_s10   ;;  %s370_s9 = sphi %s397_s9, %s433_s9  }
   0x3   : > { %p26_p1 = scmp.ge.s32.totalorder %s24_s12, 2  ;;  %p142_p2 = scmp.lt.s32.totalorder %s378_s11, 3 }
   0x5   : > { %s436_s12 = smov (%p26_p1, %s24_s12), 0  ;;  %p143_p3 = pnand %p319_p0, %p142_p2 }
   0x6   : > { %p177_p4 = scmp.lt.s32.totalorder (!%p143_p3), %s370_s9, 1  ;;  %v380_v0 = vmov (!%p143_p3), 0   ;;  %v381_v2 = vmov (!%p143_p3), 839922192   ;;  %v209_v4 = vlaneseq (!%p143_p3) }
   0x7   : > { %146 = sbr.rel (%p143_p3) target bundleno = 151 (0x97), region = 28  ;;  %355 = vset.pattern.permute.xlu0 (!%p143_p3), %v380_v0  ;;  %v207_v3 = vunpack.c.l.s4 (!%p143_p3), %v381_v2 }
   0x8   : > { %v210_v6 = vshrl.u32 (!%p143_p3), %v209_v4, 7 }
   0x9   : > { %v208_v5 = vunpack.c.0.s8 (!%p143_p3), %v207_v3 }
   0xb   : > { %v211_v7 = vsub.s32 (!%p143_p3), %v208_v5, %v210_v6 }
   0xe   : > { %s438_s9 = smov (!%p177_p4, %s370_s9), 1 }
   0xf   : > { %s322_s13 = sshll.u32 %s438_s9, 2  ;;  %s327_s17 = sshll.u32 %s438_s9, 3 }
  0x10   : > { %s189_s16 = scalar_lea.vmem %s431_s1, %s322_s13  ;;  %s184_s20 = scalar_lea.vmem %s430_s0, %s327_s17 }
  0x11   : > { %v201_v1 = vld [vmem:[%s189_s16] sm:$0xf]  ;;  %s198_s23 = scalar_lea.vmem %s432_s2, %s327_s17 }
  0x12   : > { %204 = vperm.xlu0 %355, %v201_v1   ;;  %v200_v9 = vld [vmem:[%s184_s20] sm:$0xff] }
  0x91   : > { %v205_v8 = vpop.permute.xlu0 %204 }
  0x92   : > { %v212_v10 = vrot.slane %v205_v8, %v211_v7 }
  0x94   : > { %v214_v11 = vadd.f32 %v212_v10, %v200_v9 }
  0x96   : > { %215 = vst [vmem:[%s198_s23] sm:$0xff] %v214_v11 }
  0x97 PF: > { %s12_s11 = sadd.s32 1, %s378_s11   ;;  %s433_s9 = smov %s374_s10 }
  0x98   : > { %p9_p5 = scmp.ge.s32.totalorder %s12_s11, 4   ;;  %s434_s10 = smov %s436_s12 }
  0x9a   :  { %11 = sbr.rel (!%p9_p5) target bundleno = 2 (0x2), region = 61 }

// kernel: _fwd_exact.3
= control target key start
LH: loop header
LB: loop body
LE: loop exit
PB: predicated region body
PF: predicated region fallthrough
CT: control target
= control target key end

     0   :  { %s304_s6 = smov 0   ;;  %s306_s7 = smov 0   ;;  %s334_s0 = inlined_call_operand.vmem [shape: f32[2,4,256], index: 0, kind: input, shape index: {}]   ;;  %s335_s1 = inlined_call_operand.vmem [shape: f32[2,4,1], index: 1, kind: output, shape index: {}]  }
   0x1   :  { %s308_s8 = smov 0  }
   0x2 LB: > { %s23_s9 = sadd.s32 1, %s287_s7  ;;  %p237_p0 = scmp.ge.s32.totalorder %s291_s8, 1  ;;  %s291_s8 = sphi %s308_s8, %s11_s8   ;;  %s287_s7 = sphi %s306_s7, %s337_s7   ;;  %s283_s6 = sphi %s304_s6, %s336_s6  }
   0x3   : > { %p25_p1 = scmp.ge.s32.totalorder %s23_s9, 2  ;;  %p106_p2 = scmp.lt.s32.totalorder %s291_s8, 3 }
   0x5   : > { %s339_s9 = smov (%p25_p1, %s23_s9), 0  ;;  %p107_p3 = pnand %p237_p0, %p106_p2 }
   0x6   : > { %p130_p4 = scmp.lt.s32.totalorder (!%p107_p3), %s283_s6, 1  ;;  %v293_v0 = vmov (!%p107_p3), 0.0   ;;  %vm160_vm0 = vcmask (!%p107_p3), 1043456   ;;  %vm164_vm1 = vcmask (!%p107_p3), 3072  }
   0x7   : > { %110 = sbr.rel (%p107_p3) target bundleno = 176 (0xb0), region = 24  ;;  %147 = vst [vmem:[#allocation2] sm:$0xf] (!%p107_p3), %v293_v0 }
   0xe   : > { %s341_s6 = smov (!%p130_p4, %s283_s6), 1  ;;  %v153_v3 = vld [vmem:[#allocation2] sm:$0xf] }
   0xf   : > { %s243_s10 = sshll.u32 %s341_s6, 3  ;;  %s240_s14 = sshll.u32 %s341_s6, 2 }
  0x10   : > { %s137_s13 = scalar_lea.vmem %s334_s0, %s243_s10  ;;  %s142_s17 = scalar_lea.vmem %s335_s1, %s240_s14 }
  0x11   : > { %v148_v1 = vld [vmem:[%s137_s13] sm:$0xff] }
  0x12   : > { %v150_v2 = vrot.slane %v148_v1, 4 }
  0x14   : > { %v152_v4 = vadd.f32 %v150_v2, %v148_v1 }
  0x16   : > { %v154_v5 = vadd.f32 %v153_v3, %v152_v4 }
  0x18   : > { %155 = vst [vmem:[#allocation2] sm:$0xf] %v154_v5 }
  0x1f   : > { %v159_v6 = vld [vmem:[#allocation2] sm:$0xf] }
  0x20   : > { %v161_v7 = vsel %vm160_vm0, %v159_v6, 0.0 }
  0x21   : > { %162 = vadd.xlane.f32.xlu0 %v161_v7 }
  0xae   : > { %v163_v8 = vpop.xlane.xlu0 %162 }
  0xaf   : > { %165 = vst.msk [vmem:[%s142_s17] sm:$0xf] %vm164_vm1, %v163_v8 }
  0xb0 PF: > { %s11_s8 = sadd.s32 1, %s291_s8   ;;  %s336_s6 = smov %s287_s7 }
  0xb1   : > { %p8_p5 = scmp.ge.s32.totalorder %s11_s8, 4   ;;  %s337_s7 = smov %s339_s9 }
  0xb3   :  { %10 = sbr.rel (!%p8_p5) target bundleno = 2 (0x2), region = 62 }

// kernel: _fwd_exact.4
= control target key start
LH: loop header
LB: loop body
LE: loop exit
PB: predicated region body
PF: predicated region fallthrough
CT: control target
= control target key end

     0   :  { %v19_v0 = vlaneseq  ;;  %vm29_vm0 = vcmask 25600   ;;  %vm63_vm1 = vcmask 1043456   ;;  %v271_v16 = vmov 0.0   ;;  %s342_s1 = inlined_call_operand.vmem [shape: f32[8,4], index: 1, kind: input, shape index: {}]   ;;  %s343_s0 = inlined_call_operand.vmem [shape: f32[2,4], index: 0, kind: input, shape index: {}]   ;;  %s344_s2 = inlined_call_operand.vmem [shape: f32[4,4], index: 2, kind: input, shape index: {}]   ;;  %s345_s3 = inlined_call_operand.vmem [shape: f32[4,4], index: 3, kind: input, shape index: {}]   ;;  %s346_s4 = inlined_call_operand.vmem [shape: f32[2,4], index: 4, kind: output, shape index: {}]  }
   0x1   :  { %v303_v2 = vld [vmem:[%s342_s1] sm:$0xff]  ;;  %255 = vmatprep.subr.mxu0 %v271_v16  ;;  %vm272_vm2 = vmmov 0   ;;  %260 = vmatprep.subr.mxu1 %v271_v16  ;;  %vm59_vm3 = vcmask 31744  }
   0x2   :  { %v298_v1 = vshrl.u32 %v19_v0, 7  ;;  %v17_v5 = vld [vmem:[%s343_s0] sm:$0x3]  ;;  %257 = vmatprep.mubr.msk.f32.mxu0 %vm272_vm2, %v271_v16  ;;  %262 = vmatprep.mubr.msk.f32.mxu1 %vm272_vm2, %v271_v16 }
   0x3   :  { %v54_v17 = vld [vmem:[%s344_s2] sm:$0xf] }
   0x4   :  { %v21_v3 = vsub.s32 0, %v298_v1  ;;  %v26_v4 = vsub.s32 1, %v298_v1  ;;  %256 = vmatpush3.msk.msra.mxu0 %vm63_vm1, %v54_v17  ;;  %v46_v21 = vsub.s32 2, %v298_v1  ;;  %v51_v22 = vsub.s32 3, %v298_v1  ;;  %v161_v41 = vld [vmem:[%s345_s3] sm:$0xf] }
   0x5   :  { %v57_v29 = vsub.s32 4, %v298_v1  ;;  %261 = vmatpush3.msk.msra.mxu1 %vm63_vm1, %v161_v41  ;;  %v153_v45 = vsub.s32 5, %v298_v1  ;;  %v158_v46 = vsub.s32 6, %v298_v1  ;;  %v164_v53 = vsub.s32 7, %v298_v1 }
   0x6   :  { %v22_v6 = vrot.slane %v303_v2, %v21_v3  ;;  %v27_v7 = vrot.slane %v303_v2, %v26_v4  ;;  %v47_v23 = vrot.slane %v303_v2, %v46_v21  ;;  %v52_v26 = vrot.slane %v303_v2, %v51_v22 }
   0x7   :  { %v58_v30 = vrot.slane %v303_v2, %v57_v29  ;;  %v154_v47 = vrot.slane %v303_v2, %v153_v45  ;;  %v159_v50 = vrot.slane %v303_v2, %v158_v46  ;;  %v165_v54 = vrot.slane %v303_v2, %v164_v53 }
   0x8   :  { %v23_v8 = vmul.f32 %v22_v6, %v17_v5 }
   0xa   :  { %v28_v9 = vadd.f32 %v27_v7, %v23_v8 }
   0xc   :  { %v30_v10 = vsel %vm29_vm0, %v28_v9, 0.0 }
   0xd   :  { %31 = vadd.xlane.f32.xlu0 %v30_v10 }
  0x9a   :  { %v32_v11 = vpop.xlane.xlu0 %31 }
  0x9b   :  { %v34_v12 = vmul.f32 0.25, %v32_v11 }
  0x9d   :  { %v35_v13 = vsub.f32 %v28_v9, %v34_v12 }
  0x9f   :  { %v36_v14 = vmul.f32 %v35_v13, %v35_v13 }
  0xa1   :  { %v37_v15 = vsel %vm29_vm0, %v36_v14, 0.0 }
  0xa2   :  { %38 = vadd.xlane.f32.xlu0 %v37_v15 }
 0x12f   :  { %v39_v18 = vpop.xlane.xlu0 %38 }
 0x130   :  { %v40_v19 = vmul.f32 0.25, %v39_v18 }
 0x132   :  { %v41_v20 = vadd.f32 1e-06, %v40_v19 }
 0x134   :  { %267 = vrsqrt.f32 %v41_v20 }
 0x13e   :  { %v268_v24 = vpop.eup %267 }
 0x13f   :  { %v43_v25 = vmul.f32 %v268_v24, %v35_v13 }
 0x141   :  { %v48_v27 = vmul.f32 %v47_v23, %v43_v25 }
 0x143   :  { %v53_v28 = vadd.f32 %v52_v26, %v48_v27 }
 0x145   :  { %258 = vmatmul.mubr.msk.f32.vlgmr.msra.gmra.mrb[0].mxu0 %vm59_vm3, %v53_v28 }
 0x218   :  { %v133_v31 = vpop.f32.mrb[0].mxu0 }
 0x219   :  { %v134_v32 = vadd.f32 %v133_v31, %v58_v30  ;;  %v259_v33 = vpop.f32.mrb[1].mxu0 }
 0x21b   :  { %v137_v34 = vmax.f32 %v134_v32, 0.0 }
 0x21d   :  { %v138_v35 = vsel %vm29_vm0, %v137_v34, 0.0 }
 0x21e   :  { %139 = vadd.xlane.f32.xlu1 %v138_v35 }
 0x2ab   :  { %v140_v36 = vpop.xlane.xlu1 %139 }
 0x2ac   :  { %v141_v37 = vmul.f32 0.25, %v140_v36 }
 0x2ae   :  { %v142_v38 = vsub.f32 %v137_v34, %v141_v37 }
 0x2b0   :  { %v143_v39 = vmul.f32 %v142_v38, %v142_v38 }
 0x2b2   :  { %v144_v40 = vsel %vm29_vm0, %v143_v39, 0.0 }
 0x2b3   :  { %145 = vadd.xlane.f32.xlu1 %v144_v40 }
 0x340   :  { %v146_v42 = vpop.xlane.xlu1 %145 }
 0x341   :  { %v147_v43 = vmul.f32 0.25, %v146_v42 }
 0x343   :  { %v148_v44 = vadd.f32 1e-06, %v147_v43 }
 0x345   :  { %269 = vrsqrt.f32 %v148_v44 }
 0x34f   :  { %v270_v48 = vpop.eup %269 }
 0x350   :  { %v150_v49 = vmul.f32 %v270_v48, %v142_v38 }
 0x352   :  { %v155_v51 = vmul.f32 %v154_v47, %v150_v49 }
 0x354   :  { %v160_v52 = vadd.f32 %v159_v50, %v155_v51 }
 0x356   :  { %263 = vmatmul.mubr.msk.f32.vlgmr.msra.gmra.mrb[0].mxu1 %vm59_vm3, %v160_v52 }
 0x429   :  { %v238_v55 = vpop.f32.mrb[0].mxu1 }
 0x42a   :  { %v239_v56 = vadd.f32 %v238_v55, %v165_v54  ;;  %v264_v57 = vpop.f32.mrb[1].mxu1 }
 0x42c   :  { %242 = vst.msk [vmem:[%s346_s4] sm:$0x3] %vm29_vm0, %v239_v56 }

</bundles_post_ra>
